<compile_context>
chip_gen: v7x
topology: tpu7x:2x2x1
jax: 0.10.0
libtpu: 0.0.40
codegen_flags: <defaults>
</compile_context>

<pallas_src>
import functools

import jax
import jax.numpy as jnp
from jax.experimental import pallas as pl
from jax.experimental.pallas import tpu as pltpu


def _rnn_recurrence_kernel(xw_ref, whh_ref, whead_ref, bhead_ref, out_ref):
    """Single invocation: unrolled serial recurrence + fused mu/log_var head.

    xw_ref    : (T, B, H)  time-major, already x @ W_ih + (b_ih + b_hh), f32
    whh_ref   : (H, H)     W_hh^T
    whead_ref : (H, 2L)    [W_mu^T | W_lv^T]
    bhead_ref : (1, 2L)    [b_mu   | b_lv ]
    out_ref   : (B, 2L)    [mu     | log_var]
    """
    w_hh = whh_ref[...]
    T = xw_ref.shape[0]

    # h_0 = 0 (PyTorch default)  =>  first step collapses to tanh(xw_0).
    h = jnp.tanh(xw_ref[0])

    # T is static, so a Python loop is a fully-unrolled in-kernel time loop
    # with static leading-axis indices (no grid-step overhead, no dynamic
    # slicing). Only the h @ W_hh matmul + tanh sit on the serial path.
    for t in range(1, T):
        h = jnp.tanh(
            jnp.dot(h, w_hh, preferred_element_type=jnp.float32) + xw_ref[t])

    # Fused projection of the final hidden state to [mu | log_var].
    out_ref[...] = (
        jnp.dot(h, whead_ref[...], preferred_element_type=jnp.float32)
        + bhead_ref[...]
    ).astype(out_ref.dtype)


@jax.jit
def rnn_encoder_forward(x_btd, w_ih, w_hh, b_rnn, w_mu, b_mu, w_lv, b_lv):
    """x_btd: (B, T, D) batch-first, as in the PyTorch module. Returns (mu, log_var)."""
    B, T, D = x_btd.shape
    H = w_hh.shape[0]
    L = w_mu.shape[1]

    # Hoisted input projection: one (T*B, D) @ (D, H) matmul (good MXU
    # occupancy, off the serial path), bias folded in, emitted time-major so
    # the kernel indexes the leading axis for free.
    xw = jnp.einsum("btd,dh->tbh", x_btd, w_ih,
                    preferred_element_type=jnp.float32) + b_rnn   # (T, B, H)

    # Fused output heads: one matmul / one store in the kernel.
    w_head = jnp.concatenate([w_mu, w_lv], axis=1)                # (H, 2L)
    b_head = jnp.concatenate([b_mu, b_lv], axis=1)                # (1, 2L)

    vmem = pl.BlockSpec(memory_space=pltpu.MemorySpace.VMEM)
    out = pl.pallas_call(
        _rnn_recurrence_kernel,
        out_shape=jax.ShapeDtypeStruct((B, 2 * L), jnp.float32),
        in_specs=[vmem, vmem, vmem, vmem],
        out_specs=vmem,
    )(xw, w_hh, w_head, b_head)

    mu = out[:, :L].astype(x_btd.dtype)
    log_var = out[:, L:].astype(x_btd.dtype)
    return mu, log_var


def _init_params(key, input_size, hidden_dim, latent_dim, dtype=jnp.float32):
    """Deterministic init mirroring PyTorch defaults (uniform +/- 1/sqrt(fan))."""
    ks = jax.random.split(key, 8)
    s_rnn = 1.0 / jnp.sqrt(hidden_dim)
    s_fc = 1.0 / jnp.sqrt(hidden_dim)
    u = lambda k, shape, s: jax.random.uniform(k, shape, dtype, -s, s)
    # Stored already transposed relative to PyTorch (so every matmul is x @ W).
    w_ih = u(ks[0], (input_size, hidden_dim), s_rnn)     # W_ih^T
    w_hh = u(ks[1], (hidden_dim, hidden_dim), s_rnn)     # W_hh^T
    b_ih = u(ks[2], (1, hidden_dim), s_rnn)
    b_hh = u(ks[3], (1, hidden_dim), s_rnn)
    b_rnn = b_ih + b_hh                                  # biases always summed
    w_mu = u(ks[4], (hidden_dim, latent_dim), s_fc)      # W_mu^T
    b_mu = u(ks[5], (1, latent_dim), s_fc)
    w_lv = u(ks[6], (hidden_dim, latent_dim), s_fc)      # W_lv^T
    b_lv = u(ks[7], (1, latent_dim), s_fc)
    return w_ih, w_hh, b_rnn, w_mu, b_mu, w_lv, b_lv


def _reference_forward(x_btd, w_ih, w_hh, b_rnn, w_mu, b_mu, w_lv, b_lv):
    """Pure-JAX reference (lax.scan) for correctness checking."""
    B = x_btd.shape[0]
    H = w_hh.shape[0]

    def step(h, x_t):
        h_new = jnp.tanh(x_t @ w_ih + h @ w_hh + b_rnn)
        return h_new, None

    h0 = jnp.zeros((B, H), jnp.float32)
    h_T, _ = jax.lax.scan(step, h0, jnp.transpose(x_btd, (1, 0, 2)))
    return h_T @ w_mu + b_mu, h_T @ w_lv + b_lv


if __name__ == "__main__":
    # Small shapes consistent with the module's forward:
    #   x: (batch=2, seq=8, input_size=4), rnn_nhidden=32, latent_dim=16
    B, T, D, H, L = 2, 8, 4, 32, 16

    key = jax.random.PRNGKey(0)
    k_x, k_p = jax.random.split(key)
    x = jax.random.normal(k_x, (B, T, D), jnp.float32)
    params = _init_params(k_p, D, H, L)

    mu, log_var = rnn_encoder_forward(x, *params)
    jax.block_until_ready((mu, log_var))

    mu_ref, lv_ref = _reference_forward(x, *params)
    assert mu.shape == (B, L) and log_var.shape == (B, L)
    assert jnp.allclose(mu, mu_ref, atol=1e-5, rtol=1e-5)
    assert jnp.allclose(log_var, lv_ref, atol=1e-5, rtol=1e-5)

    print("KERNEL_OK")
</pallas_src>

<mosaic_0001>
module attributes {stable_mosaic.version = 11 : i64} {
  func.func @_rnn_recurrence_kernel(%arg0: memref<8x2x32xf32, #tpu.memory_space<vmem>>, %arg1: memref<32x32xf32, #tpu.memory_space<vmem>>, %arg2: memref<32x32xf32, #tpu.memory_space<vmem>>, %arg3: memref<1x32xf32, #tpu.memory_space<vmem>>, %arg4: memref<2x32xf32, #tpu.memory_space<vmem>>) attributes {dimension_semantics = [], scalar_prefetch = 0 : i64, scratch_operands = 0 : i64, tpu.core_type = #tpu.core_type<tc>} {
    %c0 = arith.constant 0 : index
    %c0_0 = arith.constant 0 : index
    %0 = vector.load %arg1[%c0, %c0_0] : memref<32x32xf32, #tpu.memory_space<vmem>>, vector<32x32xf32>
    %c0_1 = arith.constant 0 : index
    %c0_2 = arith.constant 0 : index
    %c0_3 = arith.constant 0 : index
    %1 = vector.load %arg0[%c0_1, %c0_2, %c0_3] : memref<8x2x32xf32, #tpu.memory_space<vmem>>, vector<1x2x32xf32>
    %2 = vector.shape_cast %1 : vector<1x2x32xf32> to vector<2x32xf32>
    %3 = math.tanh %2 : vector<2x32xf32>
    %cst = arith.constant dense<0.000000e+00> : vector<2x32xf32>
    %4 = tpu.matmul %3, %0, %cst {dimension_numbers = #tpu.dot_dimension_numbers<[1], [0], [0], [1], [0, 0, 1, 1], [], []>} : vector<2x32xf32>, vector<32x32xf32>, vector<2x32xf32> -> vector<2x32xf32>
    %c1 = arith.constant 1 : index
    %c0_4 = arith.constant 0 : index
    %c0_5 = arith.constant 0 : index
    %5 = vector.load %arg0[%c1, %c0_4, %c0_5] : memref<8x2x32xf32, #tpu.memory_space<vmem>>, vector<1x2x32xf32>
    %6 = vector.shape_cast %5 : vector<1x2x32xf32> to vector<2x32xf32>
    %7 = arith.addf %4, %6 : vector<2x32xf32>
    %8 = math.tanh %7 : vector<2x32xf32>
    %cst_6 = arith.constant dense<0.000000e+00> : vector<2x32xf32>
    %9 = tpu.matmul %8, %0, %cst_6 {dimension_numbers = #tpu.dot_dimension_numbers<[1], [0], [0], [1], [0, 0, 1, 1], [], []>} : vector<2x32xf32>, vector<32x32xf32>, vector<2x32xf32> -> vector<2x32xf32>
    %c2 = arith.constant 2 : index
    %c0_7 = arith.constant 0 : index
    %c0_8 = arith.constant 0 : index
    %10 = vector.load %arg0[%c2, %c0_7, %c0_8] : memref<8x2x32xf32, #tpu.memory_space<vmem>>, vector<1x2x32xf32>
    %11 = vector.shape_cast %10 : vector<1x2x32xf32> to vector<2x32xf32>
    %12 = arith.addf %9, %11 : vector<2x32xf32>
    %13 = math.tanh %12 : vector<2x32xf32>
    %cst_9 = arith.constant dense<0.000000e+00> : vector<2x32xf32>
    %14 = tpu.matmul %13, %0, %cst_9 {dimension_numbers = #tpu.dot_dimension_numbers<[1], [0], [0], [1], [0, 0, 1, 1], [], []>} : vector<2x32xf32>, vector<32x32xf32>, vector<2x32xf32> -> vector<2x32xf32>
    %c3 = arith.constant 3 : index
    %c0_10 = arith.constant 0 : index
    %c0_11 = arith.constant 0 : index
    %15 = vector.load %arg0[%c3, %c0_10, %c0_11] : memref<8x2x32xf32, #tpu.memory_space<vmem>>, vector<1x2x32xf32>
    %16 = vector.shape_cast %15 : vector<1x2x32xf32> to vector<2x32xf32>
    %17 = arith.addf %14, %16 : vector<2x32xf32>
    %18 = math.tanh %17 : vector<2x32xf32>
    %cst_12 = arith.constant dense<0.000000e+00> : vector<2x32xf32>
    %19 = tpu.matmul %18, %0, %cst_12 {dimension_numbers = #tpu.dot_dimension_numbers<[1], [0], [0], [1], [0, 0, 1, 1], [], []>} : vector<2x32xf32>, vector<32x32xf32>, vector<2x32xf32> -> vector<2x32xf32>
    %c4 = arith.constant 4 : index
    %c0_13 = arith.constant 0 : index
    %c0_14 = arith.constant 0 : index
    %20 = vector.load %arg0[%c4, %c0_13, %c0_14] : memref<8x2x32xf32, #tpu.memory_space<vmem>>, vector<1x2x32xf32>
    %21 = vector.shape_cast %20 : vector<1x2x32xf32> to vector<2x32xf32>
    %22 = arith.addf %19, %21 : vector<2x32xf32>
    %23 = math.tanh %22 : vector<2x32xf32>
    %cst_15 = arith.constant dense<0.000000e+00> : vector<2x32xf32>
    %24 = tpu.matmul %23, %0, %cst_15 {dimension_numbers = #tpu.dot_dimension_numbers<[1], [0], [0], [1], [0, 0, 1, 1], [], []>} : vector<2x32xf32>, vector<32x32xf32>, vector<2x32xf32> -> vector<2x32xf32>
    %c5 = arith.constant 5 : index
    %c0_16 = arith.constant 0 : index
    %c0_17 = arith.constant 0 : index
    %25 = vector.load %arg0[%c5, %c0_16, %c0_17] : memref<8x2x32xf32, #tpu.memory_space<vmem>>, vector<1x2x32xf32>
    %26 = vector.shape_cast %25 : vector<1x2x32xf32> to vector<2x32xf32>
    %27 = arith.addf %24, %26 : vector<2x32xf32>
    %28 = math.tanh %27 : vector<2x32xf32>
    %cst_18 = arith.constant dense<0.000000e+00> : vector<2x32xf32>
    %29 = tpu.matmul %28, %0, %cst_18 {dimension_numbers = #tpu.dot_dimension_numbers<[1], [0], [0], [1], [0, 0, 1, 1], [], []>} : vector<2x32xf32>, vector<32x32xf32>, vector<2x32xf32> -> vector<2x32xf32>
    %c6 = arith.constant 6 : index
    %c0_19 = arith.constant 0 : index
    %c0_20 = arith.constant 0 : index
    %30 = vector.load %arg0[%c6, %c0_19, %c0_20] : memref<8x2x32xf32, #tpu.memory_space<vmem>>, vector<1x2x32xf32>
    %31 = vector.shape_cast %30 : vector<1x2x32xf32> to vector<2x32xf32>
    %32 = arith.addf %29, %31 : vector<2x32xf32>
    %33 = math.tanh %32 : vector<2x32xf32>
    %cst_21 = arith.constant dense<0.000000e+00> : vector<2x32xf32>
    %34 = tpu.matmul %33, %0, %cst_21 {dimension_numbers = #tpu.dot_dimension_numbers<[1], [0], [0], [1], [0, 0, 1, 1], [], []>} : vector<2x32xf32>, vector<32x32xf32>, vector<2x32xf32> -> vector<2x32xf32>
    %c7 = arith.constant 7 : index
    %c0_22 = arith.constant 0 : index
    %c0_23 = arith.constant 0 : index
    %35 = vector.load %arg0[%c7, %c0_22, %c0_23] : memref<8x2x32xf32, #tpu.memory_space<vmem>>, vector<1x2x32xf32>
    %36 = vector.shape_cast %35 : vector<1x2x32xf32> to vector<2x32xf32>
    %37 = arith.addf %34, %36 : vector<2x32xf32>
    %38 = math.tanh %37 : vector<2x32xf32>
    %c0_24 = arith.constant 0 : index
    %c0_25 = arith.constant 0 : index
    %39 = vector.load %arg2[%c0_24, %c0_25] : memref<32x32xf32, #tpu.memory_space<vmem>>, vector<32x32xf32>
    %cst_26 = arith.constant dense<0.000000e+00> : vector<2x32xf32>
    %40 = tpu.matmul %38, %39, %cst_26 {dimension_numbers = #tpu.dot_dimension_numbers<[1], [0], [0], [1], [0, 0, 1, 1], [], []>} : vector<2x32xf32>, vector<32x32xf32>, vector<2x32xf32> -> vector<2x32xf32>
    %c0_27 = arith.constant 0 : index
    %c0_28 = arith.constant 0 : index
    %41 = vector.load %arg3[%c0_27, %c0_28] : memref<1x32xf32, #tpu.memory_space<vmem>>, vector<1x32xf32>
    %42 = vector.broadcast %41 : vector<1x32xf32> to vector<2x32xf32>
    %43 = arith.addf %40, %42 : vector<2x32xf32>
    %c0_29 = arith.constant 0 : index
    %c0_30 = arith.constant 0 : index
    %44 = vector.load %arg4[%c0_29, %c0_30] : memref<2x32xf32, #tpu.memory_space<vmem>>, vector<2x32xf32>
    tpu.vector_store %arg4[%c0_29, %c0_30], %43 {strides = array<i32>} : memref<2x32xf32, #tpu.memory_space<vmem>>, vector<2x32xf32>,
    return
  }
}

</mosaic_0001>

<bundles_post_ra>
// kernel: rnn_encoder_forward.1
= control target key start
LH: loop header
LB: loop body
LE: loop exit
PB: predicated region body
PF: predicated region fallthrough
CT: control target
= control target key end

     0   :  { %v857_v0 = vmov 0.0|0.0   ;;  %vm858_vm0 = vmmov 0   ;;  %v859_v4 = vmov 0.0   ;;  %vm25_vm1 = vcmask 261120   ;;  %s988_s1 = inlined_call_operand.vmem [shape: f32[32,32], index: 1, kind: input, shape index: {}]   ;;  %s989_s0 = inlined_call_operand.vmem [shape: f32[8,2,32], index: 0, kind: input, shape index: {}]   ;;  %s990_s2 = inlined_call_operand.vmem [shape: f32[32,32], index: 2, kind: input, shape index: {}]   ;;  %s991_s3 = inlined_call_operand.vmem [shape: f32[1,32], index: 3, kind: input, shape index: {}]   ;;  %s992_s4 = inlined_call_operand.vmem [shape: f32[2,32], index: 4, kind: output, shape index: {}]  }
   0x1   :  { %790 = vmatprep.subr.bf16.mxu0 %v857_v0  ;;  %v17_v1 = vld [vmem:[%s988_s1] sm:$0xff]  ;;  %v18_v2 = vld [vmem:[%s988_s1 + $0x8] sm:$0xff]  ;;  %v19_v3 = vld [vmem:[%s988_s1 + $0x10] sm:$0xff]  ;;  %710 = vmatprep.mubr.msk.f32.mxu0 %vm858_vm0, %v859_v4  ;;  %vm640_vm2 = vcmask 254976  }
   0x2   :  { %v897_v5 = vpack.c.bf16 %v18_v2, %v17_v1  ;;  %v20_v6 = vld [vmem:[%s988_s1 + $0x18] sm:$0xff]  ;;  %v21_v7 = vld [vmem:[%s989_s0] sm:$0x3]  ;;  %796 = vmatprep.subr.bf16.mxu1 %v857_v0  ;;  %721 = vmatprep.mubr.msk.f32.mxu1 %vm858_vm0, %v859_v4  ;;  %v646_v10 = vld [vmem:[%s989_s0 + $0x2] sm:$0x3] }
   0x3   :  { %841 = vtanh.f32 %v21_v7  ;;  %v794_v8 = vpack.c.bf16 %v20_v6, %v19_v3  ;;  %v648_v15 = vld [vmem:[%s989_s0 + $0x4] sm:$0x3]  ;;  %v650_v20 = vld [vmem:[%s989_s0 + $0x6] sm:$0x3]  ;;  %v652_v25 = vld [vmem:[%s989_s0 + $0x8] sm:$0x3] }
   0x4   :  { %792 = vmatpush3.bf16.msra.mxu0 %v897_v5  ;;  %798 = vmatpush3.bf16.msra.mxu1 %v897_v5  ;;  %v654_v30 = vld [vmem:[%s989_s0 + $0xa] sm:$0x3]  ;;  %v656_v35 = vld [vmem:[%s989_s0 + $0xc] sm:$0x3]  ;;  %v556_v40 = vld [vmem:[%s990_s2] sm:$0xff] }
   0x5   :  { %793 = vmatprep.subr.bf16.mxu0 %v857_v0  ;;  %799 = vmatprep.subr.bf16.mxu1 %v857_v0  ;;  %v557_v41 = vld [vmem:[%s990_s2 + $0x8] sm:$0xff]  ;;  %v558_v42 = vld [vmem:[%s990_s2 + $0x10] sm:$0xff]  ;;  %v559_v44 = vld [vmem:[%s990_s2 + $0x18] sm:$0xff] }
   0x6   :  { %v833_v43 = vpack.c.bf16 %v557_v41, %v556_v40  ;;  %v836_v45 = vpack.c.bf16 %v559_v44, %v558_v42  ;;  %v658_v46 = vld [vmem:[%s989_s0 + $0xe] sm:$0x3]  ;;  %v660_v51 = vld [vmem:[%s991_s3] ss:$0 sm:$0xff] }
   0x8   :  { %795 = vmatpush3.bf16.msra.mxu0 %v794_v8  ;;  %801 = vmatpush3.bf16.msra.mxu1 %v794_v8 }
   0x9   :  { %802 = vmatprep.subr.bf16.mxu0 %v857_v0  ;;  %808 = vmatprep.subr.bf16.mxu1 %v857_v0 }
   0xd   :  { %v842_v9 = vpop.eup %841 }
   0xe   :  { %711 = vmatmul.mubr.msk.f32.vlgmr.msra.gmra.mrb[0].mxu0 %vm25_vm1, %v842_v9 }
   0xf   :  { %804 = vmatpush3.bf16.msra.mxu0 %v897_v5  ;;  %732 = vmatprep.mubr.msk.f32.mxu0 %vm858_vm0, %v859_v4 }
  0x10   :  { %805 = vmatprep.subr.bf16.mxu0 %v857_v0 }
  0x13   :  { %807 = vmatpush3.bf16.msra.mxu0 %v794_v8 }
  0x14   :  { %814 = vmatprep.subr.bf16.mxu0 %v857_v0 }
  0xe1   :  { %v95_v11 = vpop.f32.mrb[0].mxu0 }
  0xe2   :  { %v96_v12 = vadd.f32 %v646_v10, %v95_v11  ;;  %v712_v13 = vpop.f32.mrb[1].mxu0 }
  0xe4   :  { %843 = vtanh.f32 %v96_v12 }
  0xee   :  { %v844_v14 = vpop.eup %843 }
  0xef   :  { %722 = vmatmul.mubr.msk.f32.vlgmr.msra.gmra.mrb[0].mxu1 %vm25_vm1, %v844_v14 }
  0xf0   :  { %810 = vmatpush3.bf16.msra.mxu1 %v897_v5  ;;  %743 = vmatprep.mubr.msk.f32.mxu1 %vm858_vm0, %v859_v4 }
  0xf1   :  { %811 = vmatprep.subr.bf16.mxu1 %v857_v0 }
  0xf4   :  { %813 = vmatpush3.bf16.msra.mxu1 %v794_v8 }
  0xf5   :  { %820 = vmatprep.subr.bf16.mxu1 %v857_v0 }
 0x1c2   :  { %v171_v16 = vpop.f32.mrb[0].mxu1 }
 0x1c3   :  { %v172_v17 = vadd.f32 %v648_v15, %v171_v16  ;;  %v723_v18 = vpop.f32.mrb[1].mxu1 }
 0x1c5   :  { %845 = vtanh.f32 %v172_v17 }
 0x1cf   :  { %v846_v19 = vpop.eup %845 }
 0x1d0   :  { %733 = vmatmul.mubr.msk.f32.vlgmr.msra.gmra.mrb[2].mxu0 %vm25_vm1, %v846_v19 }
 0x1d1   :  { %816 = vmatpush3.bf16.msra.mxu0 %v897_v5  ;;  %754 = vmatprep.mubr.msk.f32.mxu0 %vm858_vm0, %v859_v4 }
 0x1d2   :  { %817 = vmatprep.subr.bf16.mxu0 %v857_v0 }
 0x1d5   :  { %819 = vmatpush3.bf16.msra.mxu0 %v794_v8 }
 0x1d6   :  { %826 = vmatprep.subr.bf16.mxu0 %v857_v0 }
 0x2a3   :  { %v247_v21 = vpop.f32.mrb[2].mxu0 }
 0x2a4   :  { %v248_v22 = vadd.f32 %v650_v20, %v247_v21  ;;  %v734_v23 = vpop.f32.mrb[3].mxu0 }
 0x2a6   :  { %847 = vtanh.f32 %v248_v22 }
 0x2b0   :  { %v848_v24 = vpop.eup %847 }
 0x2b1   :  { %744 = vmatmul.mubr.msk.f32.vlgmr.msra.gmra.mrb[2].mxu1 %vm25_vm1, %v848_v24 }
 0x2b2   :  { %822 = vmatpush3.bf16.msra.mxu1 %v897_v5  ;;  %765 = vmatprep.mubr.msk.f32.mxu1 %vm858_vm0, %v859_v4 }
 0x2b3   :  { %823 = vmatprep.subr.bf16.mxu1 %v857_v0 }
 0x2b6   :  { %825 = vmatpush3.bf16.msra.mxu1 %v794_v8 }
 0x2b7   :  { %832 = vmatprep.subr.bf16.mxu1 %v857_v0 }
 0x384   :  { %v323_v26 = vpop.f32.mrb[2].mxu1 }
 0x385   :  { %v324_v27 = vadd.f32 %v652_v25, %v323_v26  ;;  %v745_v28 = vpop.f32.mrb[3].mxu1 }
 0x387   :  { %849 = vtanh.f32 %v324_v27 }
 0x391   :  { %v850_v29 = vpop.eup %849 }
 0x392   :  { %755 = vmatmul.mubr.msk.f32.vlgmr.msra.gmra.mrb[4].mxu0 %vm25_vm1, %v850_v29 }
 0x393   :  { %828 = vmatpush3.bf16.msra.mxu0 %v897_v5  ;;  %776 = vmatprep.mubr.msk.f32.mxu0 %vm858_vm0, %v859_v4 }
 0x394   :  { %829 = vmatprep.subr.bf16.mxu0 %v857_v0 }
 0x397   :  { %831 = vmatpush3.bf16.msra.mxu0 %v794_v8 }
 0x465   :  { %v399_v31 = vpop.f32.mrb[4].mxu0 }
 0x466   :  { %v400_v32 = vadd.f32 %v654_v30, %v399_v31  ;;  %v756_v33 = vpop.f32.mrb[5].mxu0 }
 0x468   :  { %851 = vtanh.f32 %v400_v32 }
 0x472   :  { %v852_v34 = vpop.eup %851 }
 0x473   :  { %766 = vmatmul.mubr.msk.f32.vlgmr.msra.gmra.mrb[4].mxu1 %vm25_vm1, %v852_v34 }
 0x474   :  { %787 = vmatprep.mubr.msk.f32.mxu1 %vm858_vm0, %v859_v4  ;;  %834 = vmatpush3.bf16.msra.mxu1 %v833_v43 }
 0x475   :  { %835 = vmatprep.subr.bf16.mxu1 %v857_v0 }
 0x478   :  { %837 = vmatpush3.bf16.msra.mxu1 %v836_v45 }
 0x546   :  { %v475_v36 = vpop.f32.mrb[4].mxu1 }
 0x547   :  { %v476_v37 = vadd.f32 %v656_v35, %v475_v36  ;;  %v767_v38 = vpop.f32.mrb[5].mxu1 }
 0x549   :  { %853 = vtanh.f32 %v476_v37 }
 0x553   :  { %v854_v39 = vpop.eup %853 }
 0x554   :  { %777 = vmatmul.mubr.msk.f32.vlgmr.msra.gmra.mrb[6].mxu0 %vm25_vm1, %v854_v39 }
 0x627   :  { %v551_v47 = vpop.f32.mrb[6].mxu0 }
 0x628   :  { %v552_v48 = vadd.f32 %v658_v46, %v551_v47  ;;  %v778_v49 = vpop.f32.mrb[7].mxu0 }
 0x62a   :  { %855 = vtanh.f32 %v552_v48 }
 0x634   :  { %v856_v50 = vpop.eup %855 }
 0x635   :  { %788 = vmatmul.mubr.msk.f32.vlgmr.msra.gmra.mrb[6].mxu1 %vm25_vm1, %v856_v50 }
 0x708   :  { %v636_v52 = vpop.f32.mrb[6].mxu1 }
 0x709   :  { %v637_v53 = vadd.f32 %v660_v51, %v636_v52  ;;  %v789_v54 = vpop.f32.mrb[7].mxu1 }
 0x70b   :  { %641 = vst.msk [vmem:[%s992_s4] sm:$0x3] %vm640_vm2, %v637_v53 }

</bundles_post_ra>
